<compile_context>
chip_gen: v6e
topology: v6e:2x2x1
jax: 0.10.0
libtpu: 0.0.40
codegen_flags: <defaults>
</compile_context>

<pallas_src>
import functools
from math import sqrt

import jax
import jax.numpy as jnp
from jax.experimental import pallas as pl
from jax.experimental.pallas import tpu as pltpu


# ---------------------------------------------------------------------------
# Kernel
# ---------------------------------------------------------------------------
def _swiglu_kernel(x_ref, wgh_ref, wo_ref, o_ref, acc_ref, *, th, nj):
    # x_ref  : (tm, d_model)            token rows (constant over j)
    # wgh_ref: (d_model, 2*th)          fused [gate | hidden] columns, block j
    # wo_ref : (th, d_model)            out-projection rows, block j
    # o_ref  : (tm, d_model)            output tile (written at last j)
    # acc_ref: (tm, d_model) f32        VMEM accumulator scratch
    x = x_ref[...]
    y = jnp.dot(x, wgh_ref[...], preferred_element_type=jnp.float32)
    g = y[:, :th]              # lane-aligned (th is a multiple of 128)
    h = y[:, th:]
    act = (g * jax.nn.sigmoid(g)) * h          # SiLU(g) * h in f32
    partial = jnp.dot(act.astype(wo_ref.dtype), wo_ref[...],
                      preferred_element_type=jnp.float32)

    if nj == 1:
        # Single hidden tile: no accumulator round-trip at all.
        o_ref[...] = partial.astype(o_ref.dtype)
    else:
        j = pl.program_id(1)

        @pl.when(j == 0)
        def _first():
            acc_ref[...] = partial             # no separate zero-init pass

        @pl.when(jnp.logical_and(j > 0, j < nj - 1))
        def _mid():
            acc_ref[...] += partial

        @pl.when(j == nj - 1)
        def _last():
            # Fold the last partial into the output write (skips one full
            # (tm, d_model) f32 acc store+load per row tile).
            o_ref[...] = (acc_ref[...] + partial).astype(o_ref.dtype)


# ---------------------------------------------------------------------------
# Tiling / sizing helpers
# ---------------------------------------------------------------------------
def _round_up(a, b):
    return -(-a // b) * b


def _cdiv(a, b):
    return -(-a // b)


def _device_vmem_capacity_bytes():
    """Per-TensorCore VMEM capacity (128 MiB v5e/v6e, 64 MiB v7x)."""
    default = 128 * 1024 * 1024
    try:
        info = pltpu.get_tpu_info()
        cap = getattr(info, "vmem_capacity_bytes", None)
        if cap:
            return int(cap)
    except Exception:
        pass
    return default


def _estimate_vmem_bytes(tm, th, d_model, isz, osz):
    return (2 * tm * d_model * isz            # x block (double-buffered)
            + 2 * d_model * (2 * th) * isz    # fused [gate|hidden] weight block
            + 2 * th * d_model * isz          # out-projection weight block
            + 2 * tm * d_model * osz          # output block
            + tm * d_model * 4                # f32 accumulator scratch
            + tm * d_model * 4                # f32 partial product
            + 4 * tm * (2 * th) * 4)          # g / h / act intermediates margin


# ---------------------------------------------------------------------------
# 2-D driver (token rows x features)
# ---------------------------------------------------------------------------
def _swiglu_2d(x2d, w_gate, w_hidden, w_out, *, tm=None, th=None):
    M, d_model = x2d.shape
    d_hidden = w_gate.shape[1]
    dtype = x2d.dtype
    isz = jnp.dtype(dtype).itemsize

    vmem_cap = _device_vmem_capacity_bytes()
    budget = int(vmem_cap * 0.85)

    # Per-generation defaults: tm >= 512 everywhere (weight re-stream AI),
    # th = 1024 on ~128 MiB VMEM parts (v5e/v6e), 512 on 64 MiB parts (v7x).
    if tm is None:
        tm = 512
    if th is None:
        th = 1024 if vmem_cap >= (96 << 20) else 512

    # ---- row tile ---------------------------------------------------------
    m_rounded = _round_up(M, 8)
    tm = max(8, min(tm, m_rounded))
    # Megacore balance (v7x): keep >= 2 row tiles when each half still has
    # enough rows (>= 512) to stay compute-bound on the weight streams.
    if tm >= m_rounded and m_rounded >= 1024:
        tm = _round_up(_cdiv(m_rounded, 2), 8)

    # ---- hidden tile ------------------------------------------------------
    d_hidden_128 = _round_up(d_hidden, 128)
    th = min(_round_up(th, 128), d_hidden_128)

    # Shrink tiles until the working set fits the VMEM budget (th first,
    # then tm — never below 128 so MXU/lane tiles stay full).
    while _estimate_vmem_bytes(tm, th, d_model, isz, isz) > budget and th > 128:
        th = max(128, _round_up(th // 2, 128))
    while _estimate_vmem_bytes(tm, th, d_model, isz, isz) > budget and tm > 128:
        tm = max(128, _round_up(tm // 2, 8))

    d_hidden_pad = _round_up(d_hidden, th)
    n_j = d_hidden_pad // th

    # Cast weights to the activation dtype (pass bf16 activations for the
    # full-rate MXU path) and zero-pad the hidden dim (numerically inert).
    w_gate = w_gate.astype(dtype)
    w_hidden = w_hidden.astype(dtype)
    w_out = w_out.astype(dtype)
    if d_hidden_pad != d_hidden:
        ph = d_hidden_pad - d_hidden
        w_gate = jnp.pad(w_gate, ((0, 0), (0, ph)))
        w_hidden = jnp.pad(w_hidden, ((0, 0), (0, ph)))
        w_out = jnp.pad(w_out, ((0, ph), (0, 0)))

    # Blocked, per-j contiguous weight layouts (one contiguous DMA per block):
    #   w_gh[j] = [ W_gate[:, j*th:(j+1)*th] | W_hidden[:, j*th:(j+1)*th] ]
    #   w_o [j] =   W_out[j*th:(j+1)*th, :]
    wg_b = jnp.transpose(w_gate.reshape(d_model, n_j, th), (1, 0, 2))
    wh_b = jnp.transpose(w_hidden.reshape(d_model, n_j, th), (1, 0, 2))
    w_gh = jnp.concatenate([wg_b, wh_b], axis=2)        # (n_j, d_model, 2*th)
    w_o = w_out.reshape(n_j, th, d_model)               # (n_j, th, d_model)

    # Pad rows so M divides tm.
    m_pad = _round_up(M, tm)
    if m_pad != M:
        x2d = jnp.pad(x2d, ((0, m_pad - M), (0, 0)))
    grid_m = m_pad // tm
    grid = (grid_m, n_j)

    need = _estimate_vmem_bytes(tm, th, d_model, isz, isz)
    vmem_limit = int(min(max(need * 3 // 2, 32 * 1024 * 1024),
                         int(vmem_cap * 0.90)))

    # Weights are re-streamed from HBM once per row tile.
    w_bytes = (d_model * 2 * d_hidden_pad + d_hidden_pad * d_model) * isz
    cost = pl.CostEstimate(
        flops=6 * m_pad * d_model * d_hidden_pad,
        transcendentals=m_pad * d_hidden_pad,
        bytes_accessed=int(m_pad * d_model * isz          # x
                           + grid_m * w_bytes             # weights per row tile
                           + m_pad * d_model * isz),      # output
    )

    kernel = functools.partial(_swiglu_kernel, th=th, nj=n_j)

    out2d = pl.pallas_call(
        kernel,
        out_shape=jax.ShapeDtypeStruct((m_pad, d_model), dtype),
        grid_spec=pltpu.PrefetchScalarGridSpec(
            num_scalar_prefetch=0,
            grid=grid,
            in_specs=[
                pl.BlockSpec((tm, d_model), lambda i, j: (i, 0)),
                pl.BlockSpec((None, d_model, 2 * th), lambda i, j: (j, 0, 0)),
                pl.BlockSpec((None, th, d_model), lambda i, j: (j, 0, 0)),
            ],
            out_specs=pl.BlockSpec((tm, d_model), lambda i, j: (i, 0)),
            scratch_shapes=[pltpu.VMEM((tm, d_model), jnp.float32)],
        ),
        compiler_params=pltpu.CompilerParams(
            dimension_semantics=("parallel", "arbitrary"),
            vmem_limit_bytes=vmem_limit,
        ),
        cost_estimate=cost,
    )(x2d, w_gh, w_o)

    return out2d[:M] if m_pad != M else out2d


# ---------------------------------------------------------------------------
# Public wrappers (linear / 1x1-conv variants of the PyTorch module)
# ---------------------------------------------------------------------------
@functools.partial(jax.jit, static_argnames=("tm", "th"))
def swiglu_pallas(x, w_gate, w_hidden, w_out, *, tm=None, th=None):
    """Linear variant. x: [batch, seq, d_model]; weights pre-transposed [in, out]."""
    batch, seq, d_model = x.shape
    y = _swiglu_2d(x.reshape(batch * seq, d_model), w_gate, w_hidden, w_out,
                   tm=tm, th=th)
    return y.reshape(batch, seq, d_model)


@functools.partial(jax.jit, static_argnames=("tm", "th"))
def swiglu_conv_pallas(x, w_gate, w_hidden, w_out, *, tm=None, th=None):
    """1x1-Conv2d variant. x: [B, C, H, W]; weights pre-transposed [in, out]
    (i.e. Conv2d weight [out, in, 1, 1] squeezed and transposed)."""
    B, C, H, W = x.shape
    x2d = jnp.transpose(x, (0, 2, 3, 1)).reshape(B * H * W, C)
    y2d = _swiglu_2d(x2d, w_gate, w_hidden, w_out, tm=tm, th=th)
    d_model = y2d.shape[-1]
    return jnp.transpose(y2d.reshape(B, H, W, d_model), (0, 3, 1, 2))


# ---------------------------------------------------------------------------
# Pure-JAX references
# ---------------------------------------------------------------------------
def swiglu_reference(x, w_gate, w_hidden, w_out):
    g = jnp.einsum("bsd,dh->bsh", x, w_gate)
    h = jnp.einsum("bsd,dh->bsh", x, w_hidden)
    return jnp.einsum("bsh,hd->bsd", jax.nn.silu(g) * h, w_out)


def swiglu_conv_reference(x, w_gate, w_hidden, w_out):
    xn = jnp.transpose(x, (0, 2, 3, 1))  # NCHW -> NHWC
    g = jnp.einsum("bhwc,cd->bhwd", xn, w_gate)
    h = jnp.einsum("bhwc,cd->bhwd", xn, w_hidden)
    y = jnp.einsum("bhwd,dc->bhwc", jax.nn.silu(g) * h, w_out)
    return jnp.transpose(y, (0, 3, 1, 2))


# ---------------------------------------------------------------------------
# Demo / correctness check (small shapes)
# ---------------------------------------------------------------------------
if __name__ == "__main__":
    key = jax.random.PRNGKey(0)
    kx, kg, kh, ko, kc, kg2, kh2, ko2 = jax.random.split(key, 8)

    d_model = 32
    d_hidden = 4 * d_model  # module default

    # nn.Linear init-style synthetic weights, stored pre-transposed [in, out].
    scale_in = 1.0 / sqrt(float(d_model))
    scale_hid = 1.0 / sqrt(float(d_hidden))
    w_gate = jax.random.uniform(kg, (d_model, d_hidden), jnp.float32,
                                -scale_in, scale_in)
    w_hidden = jax.random.uniform(kh, (d_model, d_hidden), jnp.float32,
                                  -scale_in, scale_in)
    w_out = jax.random.uniform(ko, (d_hidden, d_model), jnp.float32,
                               -scale_hid, scale_hid)

    # ---- Linear variant (f32): [batch, seq, d_model] ----
    batch, seq = 2, 8
    x = jax.random.normal(kx, (batch, seq, d_model), dtype=jnp.float32)
    y = jax.block_until_ready(swiglu_pallas(x, w_gate, w_hidden, w_out))
    y_ref = swiglu_reference(x, w_gate, w_hidden, w_out)
    assert jnp.allclose(y, y_ref, atol=1e-4, rtol=1e-4), "linear f32 mismatch"

    # ---- Linear variant with d_hidden not a multiple of 128 (hidden padding) ----
    d_hidden2 = 96
    w_gate2 = jax.random.uniform(kg2, (d_model, d_hidden2), jnp.float32,
                                 -scale_in, scale_in)
    w_hidden2 = jax.random.uniform(kh2, (d_model, d_hidden2), jnp.float32,
                                   -scale_in, scale_in)
    w_out2 = jax.random.uniform(ko2, (d_hidden2, d_model), jnp.float32,
                                -1.0 / sqrt(float(d_hidden2)),
                                1.0 / sqrt(float(d_hidden2)))
    y2 = jax.block_until_ready(swiglu_pallas(x, w_gate2, w_hidden2, w_out2))
    y2_ref = swiglu_reference(x, w_gate2, w_hidden2, w_out2)
    assert jnp.allclose(y2, y2_ref, atol=1e-4, rtol=1e-4), "padded-hidden mismatch"

    # ---- Conv (1x1) variant (f32): [B, C, H, W]; B*H*W=50 exercises row padding ----
    B, H, W = 2, 5, 5
    xc = jax.random.normal(kc, (B, d_model, H, W), dtype=jnp.float32)
    yc = jax.block_until_ready(swiglu_conv_pallas(xc, w_gate, w_hidden, w_out))
    yc_ref = swiglu_conv_reference(xc, w_gate, w_hidden, w_out)
    assert jnp.allclose(yc, yc_ref, atol=1e-4, rtol=1e-4), "conv mismatch"

    # ---- bf16 production path (full-rate MXU): looser tolerance ----
    x_bf = x.astype(jnp.bfloat16)
    y_bf = jax.block_until_ready(swiglu_pallas(x_bf, w_gate, w_hidden, w_out))
    y_bf_ref = swiglu_reference(x_bf.astype(jnp.float32),
                                w_gate.astype(jnp.bfloat16).astype(jnp.float32),
                                w_hidden.astype(jnp.bfloat16).astype(jnp.float32),
                                w_out.astype(jnp.bfloat16).astype(jnp.float32))
    assert jnp.allclose(y_bf.astype(jnp.float32), y_bf_ref,
                        atol=5e-2, rtol=5e-2), "bf16 mismatch"

    print("KERNEL_OK")
</pallas_src>

<mosaic_0001>
module attributes {stable_mosaic.version = 11 : i64} {
  func.func @_swiglu_kernel(%arg0: i32, %arg1: i32, %arg2: memref<16x32xf32, #tpu.memory_space<vmem>>, %arg3: memref<1x32x256xf32, #tpu.memory_space<vmem>>, %arg4: memref<1x128x32xf32, #tpu.memory_space<vmem>>, %arg5: memref<16x32xf32, #tpu.memory_space<vmem>>, %arg6: memref<16x32xf32, #tpu.memory_space<vmem>>) attributes {dimension_semantics = [#tpu.dimension_semantics<parallel>, #tpu.dimension_semantics<arbitrary>], iteration_bounds = array<i64: 1, 1>, scalar_prefetch = 0 : i64, scratch_operands = 1 : i64, tpu.core_type = #tpu.core_type<tc>, window_params = [{transform_indices = @transform_0, window_bounds = array<i64: 16, 32>}, {transform_indices = @transform_1, window_bounds = array<i64: 1, 32, 256>}, {transform_indices = @transform_2, window_bounds = array<i64: 1, 128, 32>}, {transform_indices = @transform_3, window_bounds = array<i64: 16, 32>}]} {
    %c0 = arith.constant 0 : index
    %c0_0 = arith.constant 0 : index
    %0 = vector.load %arg2[%c0, %c0_0] : memref<16x32xf32, #tpu.memory_space<vmem>>, vector<16x32xf32>
    %c0_1 = arith.constant 0 : index
    %c0_2 = arith.constant 0 : index
    %c0_3 = arith.constant 0 : index
    %1 = vector.load %arg3[%c0_1, %c0_2, %c0_3] : memref<1x32x256xf32, #tpu.memory_space<vmem>>, vector<1x32x256xf32>
    %2 = vector.shape_cast %1 : vector<1x32x256xf32> to vector<32x256xf32>
    %cst = arith.constant dense<0.000000e+00> : vector<16x256xf32>
    %3 = tpu.matmul %0, %2, %cst {dimension_numbers = #tpu.dot_dimension_numbers<[1], [0], [0], [1], [0, 0, 1, 1], [], []>} : vector<16x32xf32>, vector<32x256xf32>, vector<16x256xf32> -> vector<16x256xf32>
    %4 = vector.extract_strided_slice %3 {offsets = [0, 0], sizes = [16, 128], strides = [1, 1]} : vector<16x256xf32> to vector<16x128xf32>
    %5 = vector.extract_strided_slice %3 {offsets = [0, 128], sizes = [16, 128], strides = [1, 1]} : vector<16x256xf32> to vector<16x128xf32>
    %6 = arith.negf %4 : vector<16x128xf32>
    %7 = math.exp %6 : vector<16x128xf32>
    %cst_4 = arith.constant 1.000000e+00 : f32
    %8 = vector.broadcast %cst_4 : f32 to vector<16x128xf32>
    %9 = arith.addf %8, %7 : vector<16x128xf32>
    %10 = arith.divf %8, %9 : vector<16x128xf32>
    %11 = arith.mulf %4, %10 : vector<16x128xf32>
    %12 = arith.mulf %11, %5 : vector<16x128xf32>
    %c0_5 = arith.constant 0 : index
    %c0_6 = arith.constant 0 : index
    %c0_7 = arith.constant 0 : index
    %13 = vector.load %arg4[%c0_5, %c0_6, %c0_7] : memref<1x128x32xf32, #tpu.memory_space<vmem>>, vector<1x128x32xf32>
    %14 = vector.shape_cast %13 : vector<1x128x32xf32> to vector<128x32xf32>
    %cst_8 = arith.constant dense<0.000000e+00> : vector<16x32xf32>
    %15 = tpu.matmul %12, %14, %cst_8 {dimension_numbers = #tpu.dot_dimension_numbers<[1], [0], [0], [1], [0, 0, 1, 1], [], []>} : vector<16x128xf32>, vector<128x32xf32>, vector<16x32xf32> -> vector<16x32xf32>
    %c0_9 = arith.constant 0 : index
    %c0_10 = arith.constant 0 : index
    %16 = vector.load %arg5[%c0_9, %c0_10] : memref<16x32xf32, #tpu.memory_space<vmem>>, vector<16x32xf32>
    tpu.vector_store %arg5[%c0_9, %c0_10], %15 {strides = array<i32>} : memref<16x32xf32, #tpu.memory_space<vmem>>, vector<16x32xf32>,
    return
  }
  func.func @transform_0(%arg0: i32, %arg1: i32) -> (i32, i32) {
    %c0_i32 = arith.constant 0 : i32
    %c0_i32_0 = arith.constant 0 : i32
    return %arg0, %c0_i32 : i32, i32
  }
  func.func @transform_1(%arg0: i32, %arg1: i32) -> (i32, i32, i32) {
    %c0_i32 = arith.constant 0 : i32
    %c0_i32_0 = arith.constant 0 : i32
    %c0_i32_1 = arith.constant 0 : i32
    return %arg1, %c0_i32, %c0_i32_0 : i32, i32, i32
  }
  func.func @transform_2(%arg0: i32, %arg1: i32) -> (i32, i32, i32) {
    %c0_i32 = arith.constant 0 : i32
    %c0_i32_0 = arith.constant 0 : i32
    %c0_i32_1 = arith.constant 0 : i32
    return %arg1, %c0_i32, %c0_i32_0 : i32, i32, i32
  }
  func.func @transform_3(%arg0: i32, %arg1: i32) -> (i32, i32) {
    %c0_i32 = arith.constant 0 : i32
    %c0_i32_0 = arith.constant 0 : i32
    return %arg0, %c0_i32 : i32, i32
  }
}

</mosaic_0001>

<bundles_post_ra>
// kernel: swiglu_pallas.1
= control target key start
LH: loop header
LB: loop body
LE: loop exit
PB: predicated region body
PF: predicated region fallthrough
CT: control target
= control target key end

     0   :  { %v325_v4 = vmov 0.0   ;;  %s434_s0 = inlined_call_operand.vmem [shape: f32[16,32], index: 0, kind: input, shape index: {}]   ;;  %s435_s1 = inlined_call_operand.vmem [shape: f32[1,32,256], index: 1, kind: input, shape index: {}]   ;;  %s436_s2 = inlined_call_operand.vmem [shape: f32[1,128,32], index: 2, kind: input, shape index: {}]   ;;  %s437_s3 = inlined_call_operand.hbm [shape: f32[16,32], index: 3, kind: output, shape index: {}]  }
   0x1   :  { %v24_v0 = vld [vmem:[%s435_s1 + $0x38] sm:$0xff]  ;;  %v23_v1 = vld [vmem:[%s435_s1 + $0x30] sm:$0xff]  ;;  %v22_v2 = vld [vmem:[%s435_s1 + $0x28] sm:$0xff]  ;;  %96 = vmatprep.mubr.f32.mxu0 %v325_v4 }
   0x2   :  { %56 = vmatprep.subr.mxu0 %v24_v0  ;;  %v21_v3 = vld [vmem:[%s435_s1 + $0x20] sm:$0xff]  ;;  %v20_v5 = vld [vmem:[%s435_s1 + $0x18] sm:$0xff]  ;;  %v19_v6 = vld [vmem:[%s435_s1 + $0x10] sm:$0xff] }
   0x3   :  { %57 = vmatpush1.msra.mxu0 %v23_v1 }
   0x4   :  { %58 = vmatprep.subr.mxu0 %v22_v2 }
   0x5   :  { %8 = vsyncpa [#allocation4], 0  ;;  %59 = vmatpush1.msra.mxu0 %v21_v3  ;;  %v18_v7 = vld [vmem:[%s435_s1 + $0x8] sm:$0xff]  ;;  %v17_v8 = vld [vmem:[%s435_s1] sm:$0xff]  ;;  %vm25_vm0 = vcmask 261120  }
   0x6   :  { %60 = vmatprep.subr.mxu0 %v20_v5  ;;  %v15_v9 = vld [vmem:[%s434_s0] sm:$0xff]  ;;  %v16_v10 = vld [vmem:[%s434_s0 + $0x8] sm:$0xff]  ;;  %v140_v11 = vld [vmem:[%s436_s2 + $0x78] sm:$0xff] }
   0x7   :  { %61 = vmatpush1.msra.mxu0 %v19_v6  ;;  %256 = vmatprep.subr.mxu1 %v140_v11  ;;  %v139_v12 = vld [vmem:[%s436_s2 + $0x70] sm:$0xff]  ;;  %v138_v13 = vld [vmem:[%s436_s2 + $0x68] sm:$0xff]  ;;  %v137_v14 = vld [vmem:[%s436_s2 + $0x60] sm:$0xff] }
   0x8   :  { %62 = vmatprep.subr.mxu0 %v18_v7  ;;  %257 = vmatpush3.msra.mxu1 %v140_v11  ;;  %v136_v15 = vld [vmem:[%s436_s2 + $0x58] sm:$0xff]  ;;  %v135_v16 = vld [vmem:[%s436_s2 + $0x50] sm:$0xff]  ;;  %v134_v17 = vld [vmem:[%s436_s2 + $0x48] sm:$0xff] }
   0x9   :  { %63 = vmatpush1.msra.mxu0 %v17_v8  ;;  %258 = vmatprep.subr.mxu1 %v139_v12  ;;  %v133_v18 = vld [vmem:[%s436_s2 + $0x40] sm:$0xff]  ;;  %v132_v19 = vld [vmem:[%s436_s2 + $0x38] sm:$0xff]  ;;  %v131_v20 = vld [vmem:[%s436_s2 + $0x30] sm:$0xff] }
   0xa   :  { %234 = vmatmul.mubr.msk.f32.vlgmr.msra.gmra.mxu0 %vm25_vm0, %v15_v9  ;;  %259 = vmatpush3.msra.mxu1 %v139_v12  ;;  %v130_v21 = vld [vmem:[%s436_s2 + $0x28] sm:$0xff]  ;;  %v129_v22 = vld [vmem:[%s436_s2 + $0x20] sm:$0xff]  ;;  %v128_v23 = vld [vmem:[%s436_s2 + $0x18] sm:$0xff] }
   0xb   :  { %102 = vmatprep.mubr.f32.mxu0 %v325_v4  ;;  %260 = vmatprep.subr.mxu1 %v138_v13  ;;  %v127_v24 = vld [vmem:[%s436_s2 + $0x10] sm:$0xff]  ;;  %v126_v25 = vld [vmem:[%s436_s2 + $0x8] sm:$0xff]  ;;  %v125_v26 = vld [vmem:[%s436_s2] sm:$0xff]  ;;  %s326_s2 = smov [#allocation3]  }
   0xc   :  { %261 = vmatpush3.msra.mxu1 %v138_v13  ;;  %s223_s7 = sshll.u32 %s326_s2, 4  ;;  %s224_s7 = int_to_ptr.vmem [resolvable:$true] %s223_s7 }
   0xd   :  { %262 = vmatprep.subr.mxu1 %v137_v14  ;;  %s303_s8 = scalar_lea.vmem %s224_s7, 256  ;;  %p308_p1 = scmp.lt.s32.totalorder %s224_s7, %s224_s7 }
   0xe   :  { %235 = vmatmul.mubr.msk.f32.gmra.mxu0 %vm25_vm0, %v16_v10  ;;  %263 = vmatpush3.msra.mxu1 %v137_v14  ;;  %p304_p0 = scmp.ne.s32.totalorder %s224_s7, %s303_s8  ;;  %p309_p2 = scmp.lt.s32.totalorder %s303_s8, %s303_s8 }
   0xf   :  { %264 = vmatprep.subr.mxu1 %v136_v15 }
  0x10   :  { %265 = vmatpush3.msra.mxu1 %v136_v15  ;;  %p310_p3 = por %p309_p2, %p308_p1 }
  0x11   :  { %266 = vmatprep.subr.mxu1 %v135_v16 }
  0x12   :  { %267 = vmatpush3.msra.mxu1 %v135_v16  ;;  %p311_p4 = pnand %p310_p3, %p304_p0 }
  0x13   :  { %268 = vmatprep.subr.mxu1 %v134_v17 }
  0x14   :  { %269 = vmatpush3.msra.mxu1 %v134_v17 }
  0x15   :  { %270 = vmatprep.subr.mxu1 %v133_v18 }
  0x16   :  { %271 = vmatpush3.msra.mxu1 %v133_v18 }
  0x17   :  { %272 = vmatprep.subr.mxu1 %v132_v19 }
  0x18   :  { %273 = vmatpush3.msra.mxu1 %v132_v19 }
  0x19   :  { %274 = vmatprep.subr.mxu1 %v131_v20 }
  0x1a   :  { %275 = vmatpush3.msra.mxu1 %v131_v20 }
  0x1b   :  { %276 = vmatprep.subr.mxu1 %v130_v21 }
  0x1c   :  { %277 = vmatpush3.msra.mxu1 %v130_v21 }
  0x1d   :  { %278 = vmatprep.subr.mxu1 %v129_v22 }
  0x1e   :  { %279 = vmatpush3.msra.mxu1 %v129_v22 }
  0x1f   :  { %280 = vmatprep.subr.mxu1 %v128_v23 }
  0x20   :  { %281 = vmatpush3.msra.mxu1 %v128_v23 }
  0x21   :  { %282 = vmatprep.subr.mxu1 %v127_v24 }
  0x22   :  { %283 = vmatpush3.msra.mxu1 %v127_v24 }
  0x23   :  { %284 = vmatprep.subr.mxu1 %v126_v25 }
  0x24   :  { %285 = vmatpush3.msra.mxu1 %v126_v25 }
  0x25   :  { %286 = vmatprep.subr.mxu1 %v125_v26 }
  0x26   :  { %287 = vmatpush3.msra.mxu1 %v125_v26 }
  0xca   :  { %v98_v27 = vpop.f32.mrf.mxu0 }
  0xcb   :  { %v236_v28 = vmul.f32 -1.442695, %v98_v27 }
  0xcc   :  { %v100_v29 = vpop.f32.mrf.mxu0 }
  0xcd   :  { %295 = vpow2.f32 %v236_v28 }
  0xce   :  { %v104_v30 = vpop.f32.mrf.mxu0 }
  0xcf   :  { %v237_v31 = vmul.f32 -1.442695, %v104_v30 }
  0xd0   :  { %v106_v41 = vpop.f32.mrf.mxu0 }
  0xd1   :  { %297 = vpow2.f32 %v237_v31 }
  0xda   :  { %v296_v32 = vpop.eup %295 }
  0xdb   :  { %v115_v33 = vadd.f32 1.0, %v296_v32 }
  0xdd   :  { %299 = vrcp.f32 %v115_v33 }
  0xde   :  { %v298_v34 = vpop.eup %297 }
  0xdf   :  { %v116_v35 = vadd.f32 1.0, %v298_v34 }
  0xe1   :  { %301 = vrcp.f32 %v116_v35 }
  0xea   :  { %v300_v36 = vpop.eup %299 }
  0xeb   :  { %v121_v37 = vmul.f32 %v300_v36, %v98_v27 }
  0xed   :  { %v123_v38 = vmul.f32 %v121_v37, %v100_v29 }
  0xee   :  { %v302_v39 = vpop.eup %301 }
  0xef   :  { %v122_v40 = vmul.f32 %v302_v39, %v104_v30  ;;  %288 = vmatprep.mubr.f32.mxu1 %v123_v38 }
  0xf1   :  { %v124_v42 = vmul.f32 %v122_v40, %v106_v41 }
  0xf3   :  { %289 = vmatmul.mubr.f32.vlgmr.msra.gmra.mxu1 %v124_v42 }
 0x1b3   :  { %v290_v43 = vpop.f32.mrf.mxu1 }
 0x1b4   :  { %217 = vst.msk [vmem:[#allocation3 + $0x8] sm:$0xff] %vm25_vm0, %v290_v43 }
 0x1b5   :  { %v207_v44 = vpop.f32.mrf.mxu1 }
 0x1b6   :  { %216 = vst.msk [vmem:[#allocation3] sm:$0xff] %vm25_vm0, %v207_v44 }
 0x1b7   :  { %314 = shalt.err (!%p311_p4)
}
 0x1b8   :  { %s327_s9 = smov 128   ;;  %s328_s0 = smov 8  }
 0x1b9   :  { %229 = dma.vmem_to_hbm [thread:$0]  %s224_s7, 256, %s437_s3, [#allocation4], %s327_s9, %s327_s9, %s328_s0  }
 0x1ba   :  { %323 = dma.done.wait [#allocation4], 256  }
 0x1bb   :  { %324 = vsyncadd [#allocation4], 4294967040 }
 0x1bc   :  { %233 = vsyncpa [#allocation4], 1 }

</bundles_post_ra>
